<compile_context>
chip_gen: v7x
topology: tpu7x:2x2x1
jax: 0.10.0
libtpu: 0.0.40
codegen_flags: <defaults>
</compile_context>

<pallas_src>
import functools

import jax
import jax.numpy as jnp
from jax.experimental import pallas as pl
from jax.experimental.pallas import tpu as pltpu

_EPS = 1e-5
_MiB = 1024 * 1024


def _withbias_ln_kernel(x_ref, w_ref, b_ref, o_ref):
    # x_ref: (bb, C, T) block -- normalize over C (sublane axis), HW on lanes.
    x = x_ref[...].astype(jnp.float32)
    inv_c = 1.0 / x.shape[1]
    s1 = jnp.sum(x, axis=1, keepdims=True)          # (bb, 1, T)
    s2 = jnp.sum(x * x, axis=1, keepdims=True)      # (bb, 1, T)
    mu = s1 * inv_c
    var = jnp.maximum(s2 * inv_c - mu * mu, 0.0)    # biased variance, f32
    inv = jax.lax.rsqrt(var + _EPS)
    w = w_ref[...].astype(jnp.float32)              # (1, C, 1) broadcast
    b = b_ref[...].astype(jnp.float32)
    o_ref[...] = ((x - mu) * inv * w + b).astype(o_ref.dtype)


def _biasfree_ln_kernel(x_ref, w_ref, o_ref):
    x = x_ref[...].astype(jnp.float32)
    inv_c = 1.0 / x.shape[1]
    s1 = jnp.sum(x, axis=1, keepdims=True)
    s2 = jnp.sum(x * x, axis=1, keepdims=True)
    mu = s1 * inv_c
    var = jnp.maximum(s2 * inv_c - mu * mu, 0.0)    # biased variance, f32
    inv = jax.lax.rsqrt(var + _EPS)
    w = w_ref[...].astype(jnp.float32)
    # NOTE: BiasFree variant divides x (not x - mu) by sqrt(var + eps)
    o_ref[...] = (x * inv * w).astype(o_ref.dtype)


def _round_up(v, m):
    return ((v + m - 1) // m) * m


def _largest_divisor_leq(n, cap):
    cap = max(1, min(n, cap))
    for d in range(cap, 0, -1):
        if n % d == 0:
            return d
    return 1


def _gen_params():
    """Generation-aware (per-block f32 x-byte target, vmem_limit_bytes)."""
    try:
        kind = jax.devices()[0].device_kind.lower()
    except Exception:
        kind = ""
    if ("v5" in kind) or ("v6" in kind) or ("v4" in kind):
        # 128 MiB VMEM generations: bigger blocks, higher scoped limit.
        return 4 * _MiB, 64 * _MiB
    # v7x (64 MiB physical VMEM) or unknown: conservative.
    # Working set ~= 2x in + 2x out + 2x f32 temps ~= 6x target -> ~12 MiB.
    return 2 * _MiB, 48 * _MiB


def _pick_blocks(b, c, hw, itemsize, target_bytes):
    """Pick (bb, tile_hw) so the per-block f32 footprint ~= target_bytes.

    Footprint uses sublane-padded C (f32 pads C to 8, bf16 to 16, int8 to 32)
    because VMEM tiles pad the second-to-last dim to the packing.
    """
    pack = max(1, 32 // max(1, itemsize * 8 // 8))  # 32-bit sublane packing
    pack = {4: 8, 2: 16, 1: 32}.get(itemsize, 8)
    c_pad = _round_up(c, pack)

    # Lane tile with bb == 1.
    max_tile = max(1, target_bytes // (c_pad * 4))   # f32 temporaries dominate
    tile_hw = min(8192, max(128, (max_tile // 128) * 128))
    if hw <= tile_hw:
        tile_hw = hw                                 # full extent: always legal

    # If a single batch fits in one block and is still small, grow the batch
    # block to amortize per-step overhead.
    bb = 1
    if tile_hw == hw:
        block_bytes = c_pad * hw * 4
        bb = _largest_divisor_leq(b, max(1, target_bytes // max(1, block_bytes)))

    # Guarantee >= 2 balanced parallel blocks (v7x has 2 TensorCores).
    grid0 = b // bb
    grid1 = pl.cdiv(hw, tile_hw)
    if grid0 * grid1 < 2:
        if b >= 2:
            bb = _largest_divisor_leq(b, max(1, bb // 2))
        elif hw >= 256:
            tile_hw = max(128, _round_up((hw + 1) // 2, 128))
    return bb, tile_hw


@functools.partial(jax.jit, static_argnames=("layer_norm_type",))
def layernorm_nchw(x, weight, bias, layer_norm_type="WithBias"):
    """Equivalent of LayerNorm(dim, LayerNorm_type).forward on NCHW input."""
    b, c, h, w = x.shape
    hw = h * w
    x3 = x.reshape(b, c, hw)                         # contiguous reshape, no transpose

    target_bytes, vmem_limit = _gen_params()
    bb, tile_hw = _pick_blocks(b, c, hw, x.dtype.itemsize, target_bytes)
    grid = (b // bb, pl.cdiv(hw, tile_hw))           # ragged last hw block is fine:
                                                     # each lane column is an independent LN

    x_spec = pl.BlockSpec((bb, c, tile_hw), lambda i, j: (i, 0, j))
    p_spec = pl.BlockSpec((1, c, 1), lambda i, j: (0, 0, 0))
    o_spec = pl.BlockSpec((bb, c, tile_hw), lambda i, j: (i, 0, j))

    w3 = weight.reshape(1, c, 1)
    cp = pltpu.CompilerParams(
        dimension_semantics=("parallel", "parallel"),
        vmem_limit_bytes=vmem_limit,
    )

    if layer_norm_type == "BiasFree":
        y3 = pl.pallas_call(
            _biasfree_ln_kernel,
            out_shape=jax.ShapeDtypeStruct((b, c, hw), x.dtype),
            grid=grid,
            in_specs=[x_spec, p_spec],
            out_specs=o_spec,
            compiler_params=cp,
        )(x3, w3)
    else:
        b3 = bias.reshape(1, c, 1)
        y3 = pl.pallas_call(
            _withbias_ln_kernel,
            out_shape=jax.ShapeDtypeStruct((b, c, hw), x.dtype),
            grid=grid,
            in_specs=[x_spec, p_spec, p_spec],
            out_specs=o_spec,
            compiler_params=cp,
        )(x3, w3, b3)

    return y3.reshape(b, c, h, w)


def _reference(x, weight, bias, layer_norm_type):
    xt = jnp.transpose(x, (0, 2, 3, 1))              # (b,h,w,c)
    mu = jnp.mean(xt, axis=-1, keepdims=True)
    var = jnp.mean((xt - mu) ** 2, axis=-1, keepdims=True)
    if layer_norm_type == "BiasFree":
        y = xt / jnp.sqrt(var + _EPS) * weight
    else:
        y = (xt - mu) / jnp.sqrt(var + _EPS) * weight + bias
    return jnp.transpose(y, (0, 3, 1, 2))


if __name__ == "__main__":
    key = jax.random.PRNGKey(0)
    kx, kw, kb = jax.random.split(key, 3)
    B, C, H, W = 2, 4, 16, 16
    x = jax.random.normal(kx, (B, C, H, W), dtype=jnp.float32)

    # deterministic parameters (perturbed from the module's ones/zeros init so
    # the weight/bias broadcast path is actually exercised)
    weight = 1.0 + 0.1 * jax.random.normal(kw, (C,), dtype=jnp.float32)
    bias = 0.1 * jax.random.normal(kb, (C,), dtype=jnp.float32)

    ok = True
    for ln_type in ("WithBias", "BiasFree"):
        out = layernorm_nchw(x, weight, bias, layer_norm_type=ln_type)
        jax.block_until_ready(out)
        ref = _reference(x, weight, bias, ln_type)
        if not jnp.allclose(out, ref, atol=2e-5, rtol=2e-5):
            ok = False

    if ok:
        print("KERNEL_OK")
</pallas_src>

<mosaic_0001>
module attributes {stable_mosaic.version = 11 : i64} {
  func.func @_withbias_ln_kernel(%arg0: i32, %arg1: i32, %arg2: memref<1x4x256xf32, #tpu.memory_space<vmem>>, %arg3: memref<1x4x1xf32, #tpu.memory_space<vmem>>, %arg4: memref<1x4x1xf32, #tpu.memory_space<vmem>>, %arg5: memref<1x4x256xf32, #tpu.memory_space<vmem>>) attributes {dimension_semantics = [#tpu.dimension_semantics<parallel>, #tpu.dimension_semantics<parallel>], iteration_bounds = array<i64: 2, 1>, scalar_prefetch = 0 : i64, scratch_operands = 0 : i64, tpu.core_type = #tpu.core_type<tc>, window_params = [{transform_indices = @transform_0, window_bounds = array<i64: 1, 4, 256>}, {pipeline_mode = #tpu.pipeline_mode<synchronous>, transform_indices = @transform_1, window_bounds = array<i64: 1, 4, 1>}, {pipeline_mode = #tpu.pipeline_mode<synchronous>, transform_indices = @transform_2, window_bounds = array<i64: 1, 4, 1>}, {transform_indices = @transform_3, window_bounds = array<i64: 1, 4, 256>}]} {
    %c0 = arith.constant 0 : index
    %c0_0 = arith.constant 0 : index
    %c0_1 = arith.constant 0 : index
    %0 = vector.load %arg2[%c0, %c0_0, %c0_1] : memref<1x4x256xf32, #tpu.memory_space<vmem>>, vector<1x4x256xf32>
    %cst = arith.constant dense<0.000000e+00> : vector<1x256xf32>
    %1 = vector.multi_reduction <add>, %0, %cst [1] : vector<1x4x256xf32> to vector<1x256xf32>
    %2 = vector.shape_cast %1 : vector<1x256xf32> to vector<1x1x256xf32>
    %3 = arith.mulf %0, %0 : vector<1x4x256xf32>
    %cst_2 = arith.constant dense<0.000000e+00> : vector<1x256xf32>
    %4 = vector.multi_reduction <add>, %3, %cst_2 [1] : vector<1x4x256xf32> to vector<1x256xf32>
    %5 = vector.shape_cast %4 : vector<1x256xf32> to vector<1x1x256xf32>
    %cst_3 = arith.constant 2.500000e-01 : f32
    %6 = vector.broadcast %cst_3 : f32 to vector<1x1x256xf32>
    %7 = arith.mulf %2, %6 : vector<1x1x256xf32>
    %cst_4 = arith.constant 2.500000e-01 : f32
    %8 = vector.broadcast %cst_4 : f32 to vector<1x1x256xf32>
    %9 = arith.mulf %5, %8 : vector<1x1x256xf32>
    %10 = arith.mulf %7, %7 : vector<1x1x256xf32>
    %11 = arith.subf %9, %10 : vector<1x1x256xf32>
    %cst_5 = arith.constant 0.000000e+00 : f32
    %12 = vector.broadcast %cst_5 : f32 to vector<1x1x256xf32>
    %13 = arith.maximumf %11, %12 : vector<1x1x256xf32>
    %cst_6 = arith.constant 9.99999974E-6 : f32
    %14 = vector.broadcast %cst_6 : f32 to vector<1x1x256xf32>
    %15 = arith.addf %13, %14 : vector<1x1x256xf32>
    %16 = math.rsqrt %15 : vector<1x1x256xf32>
    %c0_7 = arith.constant 0 : index
    %c0_8 = arith.constant 0 : index
    %c0_9 = arith.constant 0 : index
    %17 = vector.load %arg3[%c0_7, %c0_8, %c0_9] : memref<1x4x1xf32, #tpu.memory_space<vmem>>, vector<1x4x1xf32>
    %c0_10 = arith.constant 0 : index
    %c0_11 = arith.constant 0 : index
    %c0_12 = arith.constant 0 : index
    %18 = vector.load %arg4[%c0_10, %c0_11, %c0_12] : memref<1x4x1xf32, #tpu.memory_space<vmem>>, vector<1x4x1xf32>
    %19 = vector.broadcast %7 : vector<1x1x256xf32> to vector<1x4x256xf32>
    %20 = arith.subf %0, %19 : vector<1x4x256xf32>
    %21 = vector.broadcast %16 : vector<1x1x256xf32> to vector<1x4x256xf32>
    %22 = arith.mulf %20, %21 : vector<1x4x256xf32>
    %23 = vector.broadcast %17 : vector<1x4x1xf32> to vector<1x4x256xf32>
    %24 = arith.mulf %22, %23 : vector<1x4x256xf32>
    %25 = vector.broadcast %18 : vector<1x4x1xf32> to vector<1x4x256xf32>
    %26 = arith.addf %24, %25 : vector<1x4x256xf32>
    %c0_13 = arith.constant 0 : index
    %c0_14 = arith.constant 0 : index
    %c0_15 = arith.constant 0 : index
    %27 = vector.load %arg5[%c0_13, %c0_14, %c0_15] : memref<1x4x256xf32, #tpu.memory_space<vmem>>, vector<1x4x256xf32>
    tpu.vector_store %arg5[%c0_13, %c0_14, %c0_15], %26 {strides = array<i32>} : memref<1x4x256xf32, #tpu.memory_space<vmem>>, vector<1x4x256xf32>,
    return
  }
  func.func @transform_0(%arg0: i32, %arg1: i32) -> (i32, i32, i32) {
    %c0_i32 = arith.constant 0 : i32
    %c0_i32_0 = arith.constant 0 : i32
    return %arg0, %c0_i32, %arg1 : i32, i32, i32
  }
  func.func @transform_1(%arg0: i32, %arg1: i32) -> (i32, i32, i32) {
    %c0_i32 = arith.constant 0 : i32
    %c0_i32_0 = arith.constant 0 : i32
    %c0_i32_1 = arith.constant 0 : i32
    %c0_i32_2 = arith.constant 0 : i32
    return %c0_i32, %c0_i32_0, %c0_i32_1 : i32, i32, i32
  }
  func.func @transform_2(%arg0: i32, %arg1: i32) -> (i32, i32, i32) {
    %c0_i32 = arith.constant 0 : i32
    %c0_i32_0 = arith.constant 0 : i32
    %c0_i32_1 = arith.constant 0 : i32
    %c0_i32_2 = arith.constant 0 : i32
    return %c0_i32, %c0_i32_0, %c0_i32_1 : i32, i32, i32
  }
  func.func @transform_3(%arg0: i32, %arg1: i32) -> (i32, i32, i32) {
    %c0_i32 = arith.constant 0 : i32
    %c0_i32_0 = arith.constant 0 : i32
    return %arg0, %c0_i32, %arg1 : i32, i32, i32
  }
}

</mosaic_0001>

<bundles_post_ra>
// kernel: layernorm_nchw.1
= control target key start
LH: loop header
LB: loop body
LE: loop exit
PB: predicated region body
PF: predicated region fallthrough
CT: control target
= control target key end

     0   :  { %s478_s12 = smov 0   ;;  %s480_s13 = smov 0   ;;  %s524_s0 = inlined_call_operand.vmem [shape: f32[2,4,256], index: 0, kind: input, shape index: {}]   ;;  %s525_s1 = inlined_call_operand.vmem [shape: f32[1,4,1], index: 1, kind: input, shape index: {}]   ;;  %s526_s2 = inlined_call_operand.vmem [shape: f32[1,4,1], index: 2, kind: input, shape index: {}]   ;;  %s527_s3 = inlined_call_operand.vmem [shape: f32[2,4,256], index: 3, kind: output, shape index: {}]  }
   0x1   :  { %s482_s14 = smov 0  }
   0x2 LB: > { %s25_s15 = sadd.s32 1, %s450_s13  ;;  %p391_p0 = scmp.ge.s32.totalorder %s454_s14, 1  ;;  %s454_s14 = sphi %s482_s14, %s13_s14   ;;  %s450_s13 = sphi %s480_s13, %s529_s13   ;;  %s446_s12 = sphi %s478_s12, %s528_s12  }
   0x3   : > { %p27_p1 = scmp.ge.s32.totalorder %s25_s15, 2  ;;  %p158_p2 = scmp.lt.s32.totalorder %s454_s14, 3 }
   0x5   : > { %s531_s15 = smov (%p27_p1, %s25_s15), 0  ;;  %p159_p3 = pnand %p391_p0, %p158_p2 }
   0x6   : > { %v261_v0 = vld [vmem:[%s525_s1] sm:$0xf] (!%p159_p3)  ;;  %v456_v1 = vmov (!%p159_p3), 0   ;;  %p191_p4 = scmp.lt.s32.totalorder (!%p159_p3), %s446_s12, 1  ;;  %vm214_vm0 = vcmask (!%p159_p3), 1043456   ;;  %v280_v49 = vlaneseq (!%p159_p3) }
   0x7   : > { %162 = sbr.rel (%p159_p3) target bundleno = 145 (0x91), region = 32  ;;  %426 = vset.pattern.permute.xlu0 (!%p159_p3), %v456_v1  ;;  %v262_v2 = vld [vmem:[%s526_s2] sm:$0xf] (!%p159_p3)  ;;  %v457_v47 = vmov (!%p159_p3), 839922192  }
   0x8   : > { %275 = vperm.xlu0 (!%p159_p3), %426, %v261_v0   ;;  %v278_v48 = vunpack.c.l.s4 (!%p159_p3), %v457_v47  ;;  %v281_v52 = vshrl.u32 (!%p159_p3), %v280_v49, 7 }
   0xa   : > { %v279_v51 = vunpack.c.0.s8 (!%p159_p3), %v278_v48 }
   0xc   : > { %288 = vperm.xlu0 (!%p159_p3), %426, %v262_v2   ;;  %v282_v55 = vsub.s32 (!%p159_p3), %v279_v51, %v281_v52 }
   0xe   : > { %s533_s12 = smov (!%p191_p4, %s446_s12), 1 }
   0xf   : > { %s398_s20 = sshll.u32 %s533_s12, 3 }
  0x10   : > { %s198_s23 = scalar_lea.vmem %s524_s0, %s398_s20  ;;  %s208_s26 = scalar_lea.vmem %s527_s3, %s398_s20 }
  0x11   : > { %v210_v3 = vld [vmem:[%s198_s23] sm:$0xff] }
  0x12   : > { %v212_v4 = vcombine.high %v210_v3, %v210_v3  ;;  %v229_v5 = vmul.f32 %v210_v3, %v210_v3  ;;  %v215_v6 = vsel %vm214_vm0, %v210_v3, 0.0 }
  0x13   : > { %v216_v9 = vrot.slane %v215_v6, 4 }
  0x14   : > { %v222_v7 = vsel %vm214_vm0, %v212_v4, 0.0  ;;  %v231_v8 = vcombine.high %v229_v5, %v229_v5  ;;  %v233_v11 = vsel %vm214_vm0, %v229_v5, 0.0 }
  0x15   : > { %v223_v10 = vrot.slane %v222_v7, 4  ;;  %v217_v13 = vadd.f32 %v216_v9, %v215_v6  ;;  %v234_v14 = vrot.slane %v233_v11, 4 }
  0x16   : > { %v240_v12 = vsel %vm214_vm0, %v231_v8, 0.0 }
  0x17   : > { %v224_v15 = vadd.f32 %v223_v10, %v222_v7  ;;  %v241_v16 = vrot.slane %v240_v12, 4  ;;  %v218_v17 = vrot.slane %v217_v13, 2  ;;  %v235_v18 = vadd.f32 %v234_v14, %v233_v11 }
  0x19   : > { %v225_v19 = vrot.slane %v224_v15, 2  ;;  %v242_v20 = vadd.f32 %v241_v16, %v240_v12  ;;  %v219_v21 = vadd.f32 %v218_v17, %v217_v13  ;;  %v236_v22 = vrot.slane %v235_v18, 2 }
  0x1b   : > { %v226_v23 = vadd.f32 %v225_v19, %v224_v15  ;;  %v243_v24 = vrot.slane %v242_v20, 2  ;;  %v220_v25 = vrot.slane %v219_v21, 1  ;;  %v237_v26 = vadd.f32 %v236_v22, %v235_v18 }
  0x1d   : > { %v227_v27 = vrot.slane %v226_v23, 1  ;;  %v244_v28 = vadd.f32 %v243_v24, %v242_v20  ;;  %v221_v29 = vadd.f32 %v220_v25, %v219_v21  ;;  %v238_v30 = vrot.slane %v237_v26, 1 }
  0x1f   : > { %v228_v31 = vadd.f32 %v227_v27, %v226_v23  ;;  %v245_v32 = vrot.slane %v244_v28, 1  ;;  %v239_v33 = vadd.f32 %v238_v30, %v237_v26  ;;  %v247_v34 = vmul.f32 0.25, %v221_v29 }
  0x21   : > { %v246_v35 = vadd.f32 %v245_v32, %v244_v28  ;;  %v248_v36 = vmul.f32 0.25, %v228_v31  ;;  %v249_v37 = vmul.f32 0.25, %v239_v33  ;;  %v251_v38 = vmul.f32 %v247_v34, %v247_v34 }
  0x23   : > { %v250_v39 = vmul.f32 0.25, %v246_v35  ;;  %v252_v40 = vmul.f32 %v248_v36, %v248_v36  ;;  %v253_v41 = vsub.f32 %v249_v37, %v251_v38  ;;  %v265_v53 = vcombine.low %v247_v34, %v248_v36 }
  0x25   : > { %v254_v42 = vsub.f32 %v250_v39, %v252_v40  ;;  %v255_v43 = vmax.f32 %v253_v41, 0.0  ;;  %v267_v56 = vsub.f32 %v210_v3, %v265_v53 }
  0x27   : > { %v256_v44 = vmax.f32 %v254_v42, 0.0  ;;  %v257_v45 = vadd.f32 1e-05, %v255_v43 }
  0x29   : > { %v258_v46 = vadd.f32 1e-05, %v256_v44  ;;  %428 = vrsqrt.f32 %v257_v45 }
  0x2b   : > { %430 = vrsqrt.f32 %v258_v46 }
  0x33   : > { %v429_v50 = vpop.eup %428 }
  0x35   : > { %v431_v54 = vpop.eup %430 }
  0x36   : > { %v270_v57 = vcombine.low %v429_v50, %v431_v54 }
  0x38   : > { %v272_v59 = vmul.f32 %v270_v57, %v267_v56 }
  0x87   : > { %v276_v58 = vpop.permute.xlu0 %275 }
  0x88   : > { %v283_v60 = vrot.slane %v276_v58, %v282_v55 }
  0x8a   : > { %v285_v62 = vmul.f32 %v283_v60, %v272_v59 }
  0x8b   : > { %v289_v61 = vpop.permute.xlu0 %288 }
  0x8c   : > { %v296_v63 = vrot.slane %v289_v61, %v282_v55 }
  0x8e   : > { %v298_v0 = vadd.f32 %v296_v63, %v285_v62 }
  0x90   : > { %299 = vst [vmem:[%s208_s26] sm:$0xff] %v298_v0 }
  0x91 PF: > { %s13_s14 = sadd.s32 1, %s454_s14   ;;  %s528_s12 = smov %s450_s13 }
  0x92   : > { %p10_p5 = scmp.ge.s32.totalorder %s13_s14, 4   ;;  %s529_s13 = smov %s531_s15 }
  0x94   :  { %12 = sbr.rel (!%p10_p5) target bundleno = 2 (0x2), region = 62 }

</bundles_post_ra>
